<compile_context>
chip_gen: v5e
topology: v5e:2x2
jax: 0.10.0
libtpu: 0.0.40
codegen_flags: <defaults>
</compile_context>

<pallas_src>
import functools

import jax
import jax.numpy as jnp
from jax.experimental import pallas as pl
from jax.experimental.pallas import tpu as pltpu

ACTION_SCALE = 1.0
ACTION_BIAS = 0.0
LANE = 128  # TPU lane width; only the hidden dim is padded to this.


def _round_up(x, m):
    return ((x + m - 1) // m) * m


def policy_kernel(x_ref, w1_ref, b1_ref, w2_ref, b2_ref, wm_ref, bm_ref, o_ref):
    # Fused 3-layer MLP: (bf16 matmul -> f32 bias -> relu) x2, bf16 matmul -> tanh.
    x = x_ref[...]                                                      # f32 [TM, f_in]
    h1 = jnp.dot(x.astype(jnp.bfloat16), w1_ref[...],
                 preferred_element_type=jnp.float32) + b1_ref[...]      # K = f_in
    h1 = jnp.maximum(h1, 0.0)
    h2 = jnp.dot(h1.astype(jnp.bfloat16), w2_ref[...],
                 preferred_element_type=jnp.float32) + b2_ref[...]      # 128x128
    h2 = jnp.maximum(h2, 0.0)
    m = jnp.dot(h2.astype(jnp.bfloat16), wm_ref[...],
                preferred_element_type=jnp.float32) + bm_ref[...]       # N = num_actions
    # action_scale=1.0 / action_bias=0.0 fold away; if they become real
    # per-action tensors, pass them as a (1, A) VMEM input instead.
    mean = jnp.tanh(m) * ACTION_SCALE + ACTION_BIAS
    o_ref[...] = mean.astype(o_ref.dtype)


def _choose_tile(B, tm):
    """Batch tile: big (amortize per-step cost) but keep >=4 grid steps on big B."""
    tm_eff = min(tm, _round_up(B, 8))
    min_tile = 512
    if B >= 4 * min_tile:
        # >=4 steps -> 2 per TensorCore on v7x (dual-TC via "parallel" axis),
        # while never dropping below min_tile rows per step.
        tm_eff = min(tm_eff, max(min_tile, _round_up(pl.cdiv(B, 4), 8)))
    return tm_eff


@functools.partial(jax.jit, static_argnames=("tm",))
def deterministic_policy_forward(state, params, *, tm=2048):
    """state: [B, num_inputs] f32 -> mean: [B, num_actions] f32.

    params come from init_params (hidden dim zero-padded to 128 lanes,
    weights stored bf16; input/action dims kept at their true sizes).
    """
    w1, b1, w2, b2, wm, bm = params
    B, f_in = state.shape
    h_pad = w1.shape[1]          # padded hidden_dim (multiple of 128)
    n_act = wm.shape[1]          # true num_actions (unpadded)

    tm_eff = _choose_tile(B, tm)
    grid = (pl.cdiv(B, tm_eff),)  # ragged last tile is fine: rows are independent

    # Honest VMEM budget.  Narrow (f_in / n_act wide) tiles still occupy a full
    # 128-lane footprint in VMEM, so account for them lane-padded.
    f_lane = _round_up(max(f_in, 1), LANE)
    a_lane = _round_up(max(n_act, 1), LANE)
    weight_bytes = 2 * ((f_in * h_pad + h_pad * h_pad + h_pad * n_act) * 2   # bf16, dbl-buf
                        + (h_pad + h_pad + n_act) * 4)                       # f32 biases
    tile_bytes = 2 * (tm_eff * f_lane * 4 + tm_eff * a_lane * 4)             # in/out, dbl-buf
    interm_bytes = 3 * tm_eff * h_pad * 4                                    # h1, h2, m (f32)
    cast_bytes = tm_eff * f_lane * 2 + 2 * tm_eff * h_pad * 2                # bf16 casts
    vmem_limit = int(min(48 << 20,
                         max(4 << 20,
                             2 * (weight_bytes + tile_bytes + interm_bytes + cast_bytes))))

    resident = lambda shape: pl.BlockSpec(shape, lambda i: (0, 0))

    return pl.pallas_call(
        policy_kernel,
        out_shape=jax.ShapeDtypeStruct((B, n_act), jnp.float32),
        grid_spec=pltpu.PrefetchScalarGridSpec(
            num_scalar_prefetch=0,
            grid=grid,
            in_specs=[
                pl.BlockSpec((tm_eff, f_in), lambda i: (i, 0)),    # unpadded state tile
                resident(w1.shape), resident(b1.shape),            # weights/biases stay
                resident(w2.shape), resident(b2.shape),            # resident in VMEM
                resident(wm.shape), resident(bm.shape),            # (constant index_map)
            ],
            out_specs=pl.BlockSpec((tm_eff, n_act), lambda i: (i, 0)),  # unpadded output
        ),
        compiler_params=pltpu.CompilerParams(
            dimension_semantics=("parallel",),   # dual-TC sharding on v7x
            vmem_limit_bytes=vmem_limit,
        ),
    )(state, w1, b1, w2, b2, wm, bm)


def xavier_uniform(key, fan_in, fan_out, gain=1.0):
    # Matches torch.nn.init.xavier_uniform_ (gain=1): U(-a, a), a = gain*sqrt(6/(fan_in+fan_out)).
    bound = gain * (6.0 / (fan_in + fan_out)) ** 0.5
    return jax.random.uniform(
        key, (fan_in, fan_out), dtype=jnp.float32, minval=-bound, maxval=bound
    )


def init_params(key, num_inputs, num_actions, hidden_dim):
    """Xavier weights (bf16), zero biases (matches weights_init_).

    Only the hidden dim is zero-padded to 128 lanes; input/action dims stay at
    their true sizes so the kernel streams exactly the bytes it needs.
    """
    h_pad = _round_up(hidden_dim, LANE)
    dh = h_pad - hidden_dim
    k1, k2, k3 = jax.random.split(key, 3)

    w1 = jnp.pad(xavier_uniform(k1, num_inputs, hidden_dim),
                 ((0, 0), (0, dh))).astype(jnp.bfloat16)                 # [f_in, h_pad]
    w2 = jnp.pad(xavier_uniform(k2, hidden_dim, hidden_dim),
                 ((0, dh), (0, dh))).astype(jnp.bfloat16)                # [h_pad, h_pad]
    wm = jnp.pad(xavier_uniform(k3, hidden_dim, num_actions),
                 ((0, dh), (0, 0))).astype(jnp.bfloat16)                 # [h_pad, n_act]
    b1 = jnp.zeros((1, h_pad), jnp.float32)
    b2 = jnp.zeros((1, h_pad), jnp.float32)
    bm = jnp.zeros((1, num_actions), jnp.float32)
    return (w1, b1, w2, b2, wm, bm)


def reference_forward(state, params):
    """Pure-JAX reference with identical bf16-matmul / f32-accumulate numerics."""
    w1, b1, w2, b2, wm, bm = params
    x = state.astype(jnp.bfloat16)
    h1 = jnp.maximum(jnp.dot(x, w1, preferred_element_type=jnp.float32) + b1, 0.0)
    h2 = jnp.maximum(jnp.dot(h1.astype(jnp.bfloat16), w2,
                             preferred_element_type=jnp.float32) + b2, 0.0)
    m = jnp.dot(h2.astype(jnp.bfloat16), wm, preferred_element_type=jnp.float32) + bm
    return jnp.tanh(m) * ACTION_SCALE + ACTION_BIAS


if __name__ == "__main__":
    # Small shapes consistent with the module's forward: state [batch, num_inputs].
    # (In production feed B >= 2048 to amortize per-grid-step fixed cost.)
    batch, num_inputs, num_actions, hidden_dim = 2, 4, 4, 32

    key = jax.random.PRNGKey(0)
    k_state, k_params = jax.random.split(key)
    state = jax.random.normal(k_state, (batch, num_inputs), dtype=jnp.float32)
    params = init_params(k_params, num_inputs, num_actions, hidden_dim)

    mean = deterministic_policy_forward(state, params)
    mean = jax.block_until_ready(mean)

    ref = reference_forward(state, params)
    assert mean.shape == (batch, num_actions)
    # Tolerance accounts for bf16 MXU inputs (f32 accumulation).
    assert jnp.allclose(mean, ref, atol=2e-4, rtol=2e-4), (mean, ref)

    # TODO(synk): .sample() uses an in-place torch RNG draw (self.noise.normal_);
    # only the deterministic forward() hot path is implemented in the kernel.
    print("KERNEL_OK")
</pallas_src>

<mosaic_0001>
module attributes {stable_mosaic.version = 11 : i64} {
  func.func @policy_kernel(%arg0: i32, %arg1: memref<8x4xf32, #tpu.memory_space<vmem>>, %arg2: memref<4x128xbf16, #tpu.memory_space<vmem>>, %arg3: memref<1x128xf32, #tpu.memory_space<vmem>>, %arg4: memref<128x128xbf16, #tpu.memory_space<vmem>>, %arg5: memref<1x128xf32, #tpu.memory_space<vmem>>, %arg6: memref<128x4xbf16, #tpu.memory_space<vmem>>, %arg7: memref<1x4xf32, #tpu.memory_space<vmem>>, %arg8: memref<8x4xf32, #tpu.memory_space<vmem>>) attributes {dimension_semantics = [#tpu.dimension_semantics<parallel>], iteration_bounds = array<i64: 1>, scalar_prefetch = 0 : i64, scratch_operands = 0 : i64, tpu.core_type = #tpu.core_type<tc>, window_params = [{transform_indices = @transform_0, window_bounds = array<i64: 8, 4>}, {pipeline_mode = #tpu.pipeline_mode<synchronous>, transform_indices = @transform_1, window_bounds = array<i64: 4, 128>}, {pipeline_mode = #tpu.pipeline_mode<synchronous>, transform_indices = @transform_2, window_bounds = array<i64: 1, 128>}, {pipeline_mode = #tpu.pipeline_mode<synchronous>, transform_indices = @transform_3, window_bounds = array<i64: 128, 128>}, {pipeline_mode = #tpu.pipeline_mode<synchronous>, transform_indices = @transform_4, window_bounds = array<i64: 1, 128>}, {pipeline_mode = #tpu.pipeline_mode<synchronous>, transform_indices = @transform_5, window_bounds = array<i64: 128, 4>}, {pipeline_mode = #tpu.pipeline_mode<synchronous>, transform_indices = @transform_6, window_bounds = array<i64: 1, 4>}, {transform_indices = @transform_7, window_bounds = array<i64: 8, 4>}]} {
    %c0 = arith.constant 0 : index
    %c0_0 = arith.constant 0 : index
    %0 = vector.load %arg1[%c0, %c0_0] : memref<8x4xf32, #tpu.memory_space<vmem>>, vector<8x4xf32>
    %1 = arith.truncf %0 : vector<8x4xf32> to vector<8x4xbf16>
    %c0_1 = arith.constant 0 : index
    %c0_2 = arith.constant 0 : index
    %2 = vector.load %arg2[%c0_1, %c0_2] : memref<4x128xbf16, #tpu.memory_space<vmem>>, vector<4x128xbf16>
    %cst = arith.constant dense<0.000000e+00> : vector<8x128xf32>
    %3 = tpu.matmul %1, %2, %cst {dimension_numbers = #tpu.dot_dimension_numbers<[1], [0], [0], [1], [0, 0, 1, 1], [], []>} : vector<8x4xbf16>, vector<4x128xbf16>, vector<8x128xf32> -> vector<8x128xf32>
    %c0_3 = arith.constant 0 : index
    %c0_4 = arith.constant 0 : index
    %4 = vector.load %arg3[%c0_3, %c0_4] : memref<1x128xf32, #tpu.memory_space<vmem>>, vector<1x128xf32>
    %5 = vector.broadcast %4 : vector<1x128xf32> to vector<8x128xf32>
    %6 = arith.addf %3, %5 : vector<8x128xf32>
    %cst_5 = arith.constant 0.000000e+00 : f32
    %7 = vector.broadcast %cst_5 : f32 to vector<8x128xf32>
    %8 = arith.maximumf %6, %7 : vector<8x128xf32>
    %9 = arith.truncf %8 : vector<8x128xf32> to vector<8x128xbf16>
    %c0_6 = arith.constant 0 : index
    %c0_7 = arith.constant 0 : index
    %10 = vector.load %arg4[%c0_6, %c0_7] : memref<128x128xbf16, #tpu.memory_space<vmem>>, vector<128x128xbf16>
    %cst_8 = arith.constant dense<0.000000e+00> : vector<8x128xf32>
    %11 = tpu.matmul %9, %10, %cst_8 {dimension_numbers = #tpu.dot_dimension_numbers<[1], [0], [0], [1], [0, 0, 1, 1], [], []>} : vector<8x128xbf16>, vector<128x128xbf16>, vector<8x128xf32> -> vector<8x128xf32>
    %c0_9 = arith.constant 0 : index
    %c0_10 = arith.constant 0 : index
    %12 = vector.load %arg5[%c0_9, %c0_10] : memref<1x128xf32, #tpu.memory_space<vmem>>, vector<1x128xf32>
    %13 = vector.broadcast %12 : vector<1x128xf32> to vector<8x128xf32>
    %14 = arith.addf %11, %13 : vector<8x128xf32>
    %cst_11 = arith.constant 0.000000e+00 : f32
    %15 = vector.broadcast %cst_11 : f32 to vector<8x128xf32>
    %16 = arith.maximumf %14, %15 : vector<8x128xf32>
    %17 = arith.truncf %16 : vector<8x128xf32> to vector<8x128xbf16>
    %c0_12 = arith.constant 0 : index
    %c0_13 = arith.constant 0 : index
    %18 = vector.load %arg6[%c0_12, %c0_13] : memref<128x4xbf16, #tpu.memory_space<vmem>>, vector<128x4xbf16>
    %cst_14 = arith.constant dense<0.000000e+00> : vector<8x4xf32>
    %19 = tpu.matmul %17, %18, %cst_14 {dimension_numbers = #tpu.dot_dimension_numbers<[1], [0], [0], [1], [0, 0, 1, 1], [], []>} : vector<8x128xbf16>, vector<128x4xbf16>, vector<8x4xf32> -> vector<8x4xf32>
    %c0_15 = arith.constant 0 : index
    %c0_16 = arith.constant 0 : index
    %20 = vector.load %arg7[%c0_15, %c0_16] : memref<1x4xf32, #tpu.memory_space<vmem>>, vector<1x4xf32>
    %21 = vector.broadcast %20 : vector<1x4xf32> to vector<8x4xf32>
    %22 = arith.addf %19, %21 : vector<8x4xf32>
    %23 = math.tanh %22 : vector<8x4xf32>
    %cst_17 = arith.constant 1.000000e+00 : f32
    %24 = vector.broadcast %cst_17 : f32 to vector<8x4xf32>
    %25 = arith.mulf %23, %24 : vector<8x4xf32>
    %cst_18 = arith.constant 0.000000e+00 : f32
    %26 = vector.broadcast %cst_18 : f32 to vector<8x4xf32>
    %27 = arith.addf %25, %26 : vector<8x4xf32>
    %c0_19 = arith.constant 0 : index
    %c0_20 = arith.constant 0 : index
    %28 = vector.load %arg8[%c0_19, %c0_20] : memref<8x4xf32, #tpu.memory_space<vmem>>, vector<8x4xf32>
    tpu.vector_store %arg8[%c0_19, %c0_20], %27 {strides = array<i32>} : memref<8x4xf32, #tpu.memory_space<vmem>>, vector<8x4xf32>,
    return
  }
  func.func @transform_0(%arg0: i32) -> (i32, i32) {
    %c0_i32 = arith.constant 0 : i32
    %c0_i32_0 = arith.constant 0 : i32
    return %arg0, %c0_i32 : i32, i32
  }
  func.func @transform_1(%arg0: i32) -> (i32, i32) {
    %c0_i32 = arith.constant 0 : i32
    %c0_i32_0 = arith.constant 0 : i32
    %c0_i32_1 = arith.constant 0 : i32
    return %c0_i32, %c0_i32_0 : i32, i32
  }
  func.func @transform_2(%arg0: i32) -> (i32, i32) {
    %c0_i32 = arith.constant 0 : i32
    %c0_i32_0 = arith.constant 0 : i32
    %c0_i32_1 = arith.constant 0 : i32
    return %c0_i32, %c0_i32_0 : i32, i32
  }
  func.func @transform_3(%arg0: i32) -> (i32, i32) {
    %c0_i32 = arith.constant 0 : i32
    %c0_i32_0 = arith.constant 0 : i32
    %c0_i32_1 = arith.constant 0 : i32
    return %c0_i32, %c0_i32_0 : i32, i32
  }
  func.func @transform_4(%arg0: i32) -> (i32, i32) {
    %c0_i32 = arith.constant 0 : i32
    %c0_i32_0 = arith.constant 0 : i32
    %c0_i32_1 = arith.constant 0 : i32
    return %c0_i32, %c0_i32_0 : i32, i32
  }
  func.func @transform_5(%arg0: i32) -> (i32, i32) {
    %c0_i32 = arith.constant 0 : i32
    %c0_i32_0 = arith.constant 0 : i32
    %c0_i32_1 = arith.constant 0 : i32
    return %c0_i32, %c0_i32_0 : i32, i32
  }
  func.func @transform_6(%arg0: i32) -> (i32, i32) {
    %c0_i32 = arith.constant 0 : i32
    %c0_i32_0 = arith.constant 0 : i32
    %c0_i32_1 = arith.constant 0 : i32
    return %c0_i32, %c0_i32_0 : i32, i32
  }
  func.func @transform_7(%arg0: i32) -> (i32, i32) {
    %c0_i32 = arith.constant 0 : i32
    %c0_i32_0 = arith.constant 0 : i32
    return %arg0, %c0_i32 : i32, i32
  }
}

</mosaic_0001>

<bundles_post_ra>
// kernel: deterministic_policy_forward.1
= control target key start
LH: loop header
LB: loop body
LE: loop exit
PB: predicated region body
PF: predicated region fallthrough
CT: control target
= control target key end

     0   :  { %12 = vsyncpa [#allocation3], 0  ;;  %s555_s0 = inlined_call_operand.vmem [shape: f32[2,4], index: 0, kind: input, shape index: {}]   ;;  %s556_s1 = inlined_call_operand.hbm [shape: bf16[4,128], index: 1, kind: input, shape index: {}]   ;;  %s557_s2 = inlined_call_operand.vmem [shape: f32[1,128], index: 2, kind: input, shape index: {}]   ;;  %s558_s3 = inlined_call_operand.vmem [shape: bf16[128,128], index: 3, kind: input, shape index: {}]   ;;  %s559_s4 = inlined_call_operand.hbm [shape: f32[1,128], index: 4, kind: input, shape index: {}]   ;;  %s560_s5 = inlined_call_operand.vmem [shape: bf16[128,4], index: 5, kind: input, shape index: {}]   ;;  %s561_s6 = inlined_call_operand.vmem [shape: f32[1,4], index: 6, kind: input, shape index: {}]   ;;  %s562_s7 = inlined_call_operand.hbm [shape: f32[2,4], index: 7, kind: output, shape index: {}]  }
   0x1   :  { %13 = vsyncpa [#allocation6], 0 }
   0x2   :  { %14 = vsyncpa [#allocation4], 0  ;;  %s22_s26 = sshll.u32 %s556_s1, 4  ;;  %s442_s27 = smov [#allocation2]   ;;  %s23_s26 = int_to_ptr.hbm [resolvable:$true] %s22_s26 }
   0x3   :  { %s24_s28 = sshll.u32 %s442_s27, 4  ;;  %s37_s8 = sshll.u32 %s559_s4, 4  ;;  %s25_s28 = int_to_ptr.vmem [resolvable:$true] %s24_s28  ;;  %s38_s8 = int_to_ptr.hbm [resolvable:$true] %s37_s8 }
   0x4   :  { %27 = dma.hbm_to_vmem [thread:$0]  %s23_s26, 32, %s25_s28, [#allocation3]  }
   0x5   :  { %s443_s9 = smov [#allocation5]  }
   0x6   :  { %s39_s10 = sshll.u32 %s443_s9, 4  ;;  %s40_s10 = int_to_ptr.vmem [resolvable:$true] %s39_s10 }
   0x7   :  { %42 = dma.hbm_to_vmem [thread:$0]  %s38_s8, 16, %s40_s10, [#allocation6]  }
   0x8   :  { %436 = dma.done.wait [#allocation3], 32  }
   0x9   :  { %437 = vsyncadd [#allocation3], 4294967264 }
   0xa   :  { %438 = dma.done.wait [#allocation6], 16  }
   0xb   :  { %439 = vsyncadd [#allocation6], 4294967280  ;;  %vm67_vm0 = vcmask 1041408   ;;  %v58_v0 = vld [vmem:[#allocation2] sm:$0x3]  ;;  %v345_v2 = vld [vmem:[%s558_s3 + $0x38] sm:$0xff] }
   0xc   :  { %v56_v1 = vld [vmem:[%s555_s0] sm:$0xff]  ;;  %v69_v3 = vsel %vm67_vm0, %v58_v0, 0  ;;  %vm63_vm1 = vcmask 31744   ;;  %154 = vmatpush.bf16.msra.mxu1 %v345_v2  ;;  %v344_v5 = vld [vmem:[%s558_s3 + $0x30] sm:$0xff]  ;;  %v343_v6 = vld [vmem:[%s558_s3 + $0x28] sm:$0xff] }
   0xd   :  { %v57_v4 = vpack.c.bf16 %v56_v1, %v56_v1  ;;  %78 = vmatpush.bf16.msra.mxu0 %v69_v3  ;;  %v342_v7 = vld [vmem:[%s558_s3 + $0x20] sm:$0xff]  ;;  %v341_v8 = vld [vmem:[%s558_s3 + $0x18] sm:$0xff]  ;;  %v340_v9 = vld [vmem:[%s558_s3 + $0x10] sm:$0xff] }
   0xe   :  { %v339_v10 = vld [vmem:[%s558_s3 + $0x8] sm:$0xff]  ;;  %v338_v11 = vld [vmem:[%s558_s3] sm:$0xff]  ;;  %v353_v12 = vld [vmem:[%s560_s5 + $0x38] sm:$0xff] }
   0xf   :  { %237 = vmatpush.bf16.msra.mxu2 %v353_v12  ;;  %v352_v13 = vld [vmem:[%s560_s5 + $0x30] sm:$0xff]  ;;  %v351_v14 = vld [vmem:[%s560_s5 + $0x28] sm:$0xff]  ;;  %v350_v15 = vld [vmem:[%s560_s5 + $0x20] sm:$0xff] }
  0x10   :  { %273 = vmatmul.msk.bf16.vlgmr.msra.gmra.mxu0 %vm63_vm1, %v57_v4  ;;  %155 = vmatpush.bf16.msra.mxu1 %v344_v5  ;;  %v349_v16 = vld [vmem:[%s560_s5 + $0x18] sm:$0xff]  ;;  %v348_v17 = vld [vmem:[%s560_s5 + $0x10] sm:$0xff]  ;;  %v359_v18 = vld [vmem:[%s557_s2] ss:$0 sm:$0xff] }
  0x11   :  { %v347_v24 = vld [vmem:[%s560_s5 + $0x8] sm:$0xff]  ;;  %v346_v25 = vld [vmem:[%s560_s5] sm:$0xff] }
  0x12   :  { %v360_v26 = vld [vmem:[#allocation5] ss:$0 sm:$0xff]  ;;  %v361_v32 = vld [vmem:[%s561_s6] ss:$0 sm:$0xff] }
  0x13   :  { %238 = vmatpush.bf16.msra.mxu2 %v352_v13 }
  0x14   :  { %156 = vmatpush.bf16.msra.mxu1 %v343_v6 }
  0x17   :  { %239 = vmatpush.bf16.msra.mxu2 %v351_v14 }
  0x18   :  { %157 = vmatpush.bf16.msra.mxu1 %v342_v7 }
  0x1b   :  { %240 = vmatpush.bf16.msra.mxu2 %v350_v15 }
  0x1c   :  { %158 = vmatpush.bf16.msra.mxu1 %v341_v8 }
  0x1f   :  { %241 = vmatpush.bf16.msra.mxu2 %v349_v16 }
  0x20   :  { %159 = vmatpush.bf16.msra.mxu1 %v340_v9 }
  0x23   :  { %242 = vmatpush.bf16.msra.mxu2 %v348_v17 }
  0x24   :  { %160 = vmatpush.bf16.msra.mxu1 %v339_v10 }
  0x27   :  { %243 = vmatpush.bf16.msra.mxu2 %v347_v24 }
  0x28   :  { %161 = vmatpush.bf16.msra.mxu1 %v338_v11 }
  0x2b   :  { %244 = vmatpush.bf16.msra.mxu2 %v346_v25 }
  0x8d   :  { %v80_v19 = vpop.f32.mrf.mxu0 }
  0x8e   :  { %v81_v20 = vadd.f32 %v359_v18, %v80_v19 }
  0x90   :  { %v84_v21 = vmax.f32 %v81_v20, 0.0 }
  0x92   :  { %v85_v22 = vpack.c.bf16 %v84_v21, %v84_v21 }
  0x94   :  { %162 = vmatmul.bf16.vlgmr.msra.gmra.mxu1 %v85_v22 }
  0x95   :  { %v82_v23 = vpop.f32.mrf.mxu0 }
 0x111   :  { %v163_v27 = vpop.f32.mrf.mxu1 }
 0x112   :  { %v164_v28 = vadd.f32 %v360_v26, %v163_v27 }
 0x114   :  { %v167_v29 = vmax.f32 %v164_v28, 0.0 }
 0x116   :  { %v168_v30 = vpack.c.bf16 %v167_v29, %v167_v29 }
 0x118   :  { %245 = vmatmul.bf16.vlgmr.msra.gmra.mxu2 %v168_v30 }
 0x119   :  { %v165_v31 = vpop.f32.mrf.mxu1 }
 0x19b   :  { %v246_v33 = vpop.f32.mrf.mxu2 }
 0x19c   :  { %v247_v34 = vadd.f32 %v361_v32, %v246_v33 }
 0x19e   :  { %362 = vtanh.f32 %v247_v34 }
 0x1a3   :  { %v248_v35 = vpop.f32.mrf.mxu2 }
 0x1a4   :  { %v363_v36 = vpop.eup %362 }
 0x1a5   :  { %252 = vst.msk [vmem:[#allocation7] sm:$0xff] %vm63_vm1, %v363_v36 }
 0x1a6   :  { %256 = vsyncadd [#allocation4], 96  ;;  %s259_s19 = sshll.u32 %s562_s7, 4  ;;  %s444_s20 = smov [#allocation7]   ;;  %s260_s19 = int_to_ptr.hbm [resolvable:$true] %s259_s19 }
 0x1a7   :  { %s257_s21 = sshll.u32 %s444_s20, 4  ;;  %s445_s22 = smov 32   ;;  %s258_s21 = int_to_ptr.vmem [resolvable:$true] %s257_s21 }
 0x1a8   :  { %s446_s23 = smov 2  }
 0x1a9   :  { %265 = dma.vmem_to_hbm [thread:$0]  %s258_s21, 32, %s260_s19, [#allocation4], %s445_s22, %s445_s22, %s446_s23  }
 0x1aa   :  { %440 = dma.done.wait [#allocation4], 128  }
 0x1ab   :  { %441 = vsyncadd [#allocation4], 4294967168 }
 0x1ac   :  { %270 = vsyncpa [#allocation3], 1 }
 0x1ad   :  { %271 = vsyncpa [#allocation6], 1 }
 0x1ae   :  { %272 = vsyncpa [#allocation4], 1 }

</bundles_post_ra>
